<compile_context>
chip_gen: v7x
topology: tpu7x:2x2x1
jax: 0.10.0
libtpu: 0.0.40
codegen_flags: <defaults>
</compile_context>

<pallas_src>
import jax
import jax.numpy as jnp
from jax.experimental import pallas as pl
from jax.experimental.pallas import tpu as pltpu

LANE = 128  # TPU vreg lane width


def mlp_kernel(x_ref, p_ref, o_ref):
    # x_ref: (1, TB)  -- batch on lanes (lane-dense)
    # p_ref: (H, 4)   -- columns: [w1, b1, w2, b2 (at row 0)]
    # o_ref: (1, TB)
    x = x_ref[...]                        # (1, TB)
    p = p_ref[...]                        # (H, 4)
    w1 = p[:, 0:1]                        # (H, 1)
    b1 = p[:, 1:2]                        # (H, 1)
    w2 = p[:, 2:3]                        # (H, 1)
    b2 = p[0:1, 3:4]                      # (1, 1)

    # Linear(1, H): K=1 matmul -> pure VPU broadcast outer product + bias + ReLU.
    h = jnp.maximum(w1 * x + b1, 0.0)     # (H, TB)
    # Linear(H, 1): N=1 matmul -> VPU multiply + XLU sublane reduction + bias.
    y = jnp.sum(h * w2, axis=0, keepdims=True) + b2   # (1, TB), lane-dense
    o_ref[...] = y.astype(o_ref.dtype)


def simple_nn_forward(x, w1, b1, w2, b2, *, batch_tile=512):
    """Forward pass of SimpleNN.

    x: (B, 1) float32
    w1: (H, 1), b1: (H,), w2: (1, H), b2: (1,)   (PyTorch nn.Linear layouts)
    Returns (B, 1) float32.
    """
    B = x.shape[0]
    H = w1.shape[0]

    # Pack all parameters into one small VMEM array -> single parameter DMA.
    params = jnp.concatenate(
        [w1.reshape(H, 1).astype(jnp.float32),
         b1.reshape(H, 1).astype(jnp.float32),
         w2.reshape(H, 1).astype(jnp.float32),
         jnp.pad(b2.reshape(1, 1).astype(jnp.float32), ((0, H - 1), (0, 0)))],
        axis=1)                                            # (H, 4)

    # Lane-dense batch layout, padded to a multiple of 128 lanes.
    B_pad = max(LANE, ((B + LANE - 1) // LANE) * LANE)
    tb = min(B_pad, max(LANE, (batch_tile // LANE) * LANE))
    while B_pad % tb:                  # keep the grid evenly divisible
        tb -= LANE
    x_lane = jnp.zeros((1, B_pad), jnp.float32).at[0, :B].set(
        x[:, 0].astype(jnp.float32))

    out_lane = pl.pallas_call(
        mlp_kernel,
        out_shape=jax.ShapeDtypeStruct((1, B_pad), jnp.float32),
        grid=(B_pad // tb,),
        in_specs=[
            pl.BlockSpec((1, tb), lambda i: (0, i)),          # x tile
            pl.BlockSpec(params.shape, lambda i: (0, 0)),     # params stay resident
        ],
        out_specs=pl.BlockSpec((1, tb), lambda i: (0, i)),
        compiler_params=pltpu.CompilerParams(
            dimension_semantics=("parallel",)),               # megacore on v7x
    )(x_lane, params)

    # Back to the PyTorch-facing (B, 1) shape.
    return out_lane[0, :B].reshape(B, 1)


if __name__ == "__main__":
    key = jax.random.PRNGKey(0)
    k_x, k_w1, k_b1, k_w2, k_b2 = jax.random.split(key, 5)

    B, D_IN, D_HID, D_OUT = 8, 1, 20, 1

    # Deterministic synthetic inputs / parameters (PyTorch nn.Linear shapes).
    x = jax.random.normal(k_x, (B, D_IN), dtype=jnp.float32)
    w1 = jax.random.normal(k_w1, (D_HID, D_IN), dtype=jnp.float32) * 0.5   # linear1.weight
    b1 = jax.random.normal(k_b1, (D_HID,), dtype=jnp.float32) * 0.1        # linear1.bias
    w2 = jax.random.normal(k_w2, (D_OUT, D_HID), dtype=jnp.float32) * 0.5  # linear2.weight
    b2 = jax.random.normal(k_b2, (D_OUT,), dtype=jnp.float32) * 0.1        # linear2.bias

    out = simple_nn_forward(x, w1, b1, w2, b2)
    jax.block_until_ready(out)

    # Reference: PyTorch semantics y = relu(x @ W1^T + b1) @ W2^T + b2
    ref = jnp.maximum(x @ w1.T + b1, 0.0) @ w2.T + b2
    assert out.shape == (B, D_OUT)
    assert jnp.allclose(out, ref, atol=1e-5, rtol=1e-5)

    print("KERNEL_OK")
</pallas_src>

<mosaic_0001>
module attributes {stable_mosaic.version = 11 : i64} {
  func.func @mlp_kernel(%arg0: i32, %arg1: memref<1x128xf32, #tpu.memory_space<vmem>>, %arg2: memref<20x4xf32, #tpu.memory_space<vmem>>, %arg3: memref<1x128xf32, #tpu.memory_space<vmem>>) attributes {dimension_semantics = [#tpu.dimension_semantics<parallel>], iteration_bounds = array<i64: 1>, scalar_prefetch = 0 : i64, scratch_operands = 0 : i64, tpu.core_type = #tpu.core_type<tc>, window_params = [{transform_indices = @transform_0, window_bounds = array<i64: 1, 128>}, {pipeline_mode = #tpu.pipeline_mode<synchronous>, transform_indices = @transform_1, window_bounds = array<i64: 20, 4>}, {transform_indices = @transform_2, window_bounds = array<i64: 1, 128>}]} {
    %c0 = arith.constant 0 : index
    %c0_0 = arith.constant 0 : index
    %0 = vector.load %arg1[%c0, %c0_0] : memref<1x128xf32, #tpu.memory_space<vmem>>, vector<1x128xf32>
    %c0_1 = arith.constant 0 : index
    %c0_2 = arith.constant 0 : index
    %1 = vector.load %arg2[%c0_1, %c0_2] : memref<20x4xf32, #tpu.memory_space<vmem>>, vector<20x4xf32>
    %2 = vector.extract_strided_slice %1 {offsets = [0, 0], sizes = [20, 1], strides = [1, 1]} : vector<20x4xf32> to vector<20x1xf32>
    %3 = vector.extract_strided_slice %1 {offsets = [0, 1], sizes = [20, 1], strides = [1, 1]} : vector<20x4xf32> to vector<20x1xf32>
    %4 = vector.extract_strided_slice %1 {offsets = [0, 2], sizes = [20, 1], strides = [1, 1]} : vector<20x4xf32> to vector<20x1xf32>
    %5 = vector.extract_strided_slice %1 {offsets = [0, 3], sizes = [1, 1], strides = [1, 1]} : vector<20x4xf32> to vector<1x1xf32>
    %6 = vector.broadcast %2 : vector<20x1xf32> to vector<20x128xf32>
    %7 = vector.broadcast %0 : vector<1x128xf32> to vector<20x128xf32>
    %8 = arith.mulf %6, %7 : vector<20x128xf32>
    %9 = vector.broadcast %3 : vector<20x1xf32> to vector<20x128xf32>
    %10 = arith.addf %8, %9 : vector<20x128xf32>
    %cst = arith.constant 0.000000e+00 : f32
    %11 = vector.broadcast %cst : f32 to vector<20x128xf32>
    %12 = arith.maximumf %10, %11 : vector<20x128xf32>
    %13 = vector.broadcast %4 : vector<20x1xf32> to vector<20x128xf32>
    %14 = arith.mulf %12, %13 : vector<20x128xf32>
    %cst_3 = arith.constant dense<0.000000e+00> : vector<128xf32>
    %15 = vector.multi_reduction <add>, %14, %cst_3 [0] : vector<20x128xf32> to vector<128xf32>
    %16 = vector.shape_cast %15 : vector<128xf32> to vector<1x128xf32>
    %17 = vector.broadcast %5 : vector<1x1xf32> to vector<1x128xf32>
    %18 = arith.addf %16, %17 : vector<1x128xf32>
    %c0_4 = arith.constant 0 : index
    %c0_5 = arith.constant 0 : index
    %19 = vector.load %arg3[%c0_4, %c0_5] : memref<1x128xf32, #tpu.memory_space<vmem>>, vector<1x128xf32>
    tpu.vector_store %arg3[%c0_4, %c0_5], %18 {strides = array<i32>} : memref<1x128xf32, #tpu.memory_space<vmem>>, vector<1x128xf32>,
    return
  }
  func.func @transform_0(%arg0: i32) -> (i32, i32) {
    %c0_i32 = arith.constant 0 : i32
    %c0_i32_0 = arith.constant 0 : i32
    return %c0_i32, %arg0 : i32, i32
  }
  func.func @transform_1(%arg0: i32) -> (i32, i32) {
    %c0_i32 = arith.constant 0 : i32
    %c0_i32_0 = arith.constant 0 : i32
    %c0_i32_1 = arith.constant 0 : i32
    return %c0_i32, %c0_i32_0 : i32, i32
  }
  func.func @transform_2(%arg0: i32) -> (i32, i32) {
    %c0_i32 = arith.constant 0 : i32
    %c0_i32_0 = arith.constant 0 : i32
    return %c0_i32, %arg0 : i32, i32
  }
}

</mosaic_0001>

<bundles_post_ra>
// kernel: tpu_custom_call.1
= control target key start
LH: loop header
LB: loop body
LE: loop exit
PB: predicated region body
PF: predicated region fallthrough
CT: control target
= control target key end

     0   :  { %v141_v2 = vmov 0   ;;  %s185_s0 = inlined_call_operand.vmem [shape: f32[1,128], index: 0, kind: input, shape index: {}]   ;;  %s186_s1 = inlined_call_operand.vmem [shape: f32[20,4], index: 1, kind: input, shape index: {}]   ;;  %s187_s2 = inlined_call_operand.hbm [shape: f32[1,128], index: 2, kind: output, shape index: {}]  }
   0x1   :  { %v15_v0 = vld [vmem:[%s186_s1 + $0x10] sm:$0xf]  ;;  %v13_v1 = vld [vmem:[%s186_s1] sm:$0xff]  ;;  %110 = vset.pattern.permute.xlu1 %v141_v2  ;;  %109 = vset.pattern.permute.xlu0 %v141_v2 }
   0x2   :  { %7 = vsyncpa [#allocation3], 0  ;;  %28 = vperm.xlu1 %110, %v15_v0   ;;  %18 = vperm.xlu0 %109, %v13_v1   ;;  %v14_v3 = vld [vmem:[%s186_s1 + $0x8] sm:$0xff]  ;;  %v142_v4 = vmov 1   ;;  %v143_v5 = vmov 2   ;;  %v144_v6 = vmov 3  }
   0x3   :  { %v103_v10 = vld [vmem:[%s185_s0] ss:$0 sm:$0xff]  ;;  %vm74_vm0 = vcmask 1043456   ;;  %s145_s0 = smov [#allocation2]  }
   0x4   :  { %s95_s16 = sshll.u32 %s145_s0, 4  ;;  %s96_s16 = int_to_ptr.vmem [resolvable:$true] %s95_s16 }
   0x5   :  { %s117_s17 = scalar_lea.vmem %s96_s16, 16  ;;  %s121_s18 = scalar_lea.vmem %s96_s16, 32 }
   0x6   :  { %111 = vset.pattern.permute.xlu1 %v142_v4  ;;  %23 = vperm.xlu0 %109, %v14_v3   ;;  %p118_p0 = scmp.ne.s32.totalorder %s96_s16, %s117_s17  ;;  %p122_p1 = scmp.lt.s32.totalorder %s96_s16, %s96_s16 }
   0x7   :  { %41 = vperm.xlu1 %111, %v13_v1   ;;  %p123_p2 = scmp.lt.s32.totalorder %s121_s18, %s117_s17 }
   0x9   :  { %p124_p3 = por %p123_p2, %p122_p1 }
   0xa   :  { %112 = vset.pattern.permute.xlu0 %v142_v4 }
   0xb   :  { %49 = vperm.xlu1 %111, %v15_v0   ;;  %45 = vperm.xlu0 %112, %v14_v3   ;;  %p125_p4 = pnand %p124_p3, %p118_p0 }
   0xf   :  { %113 = vset.pattern.permute.xlu1 %v143_v5  ;;  %114 = vset.pattern.permute.xlu0 %v143_v5 }
  0x10   :  { %59 = vperm.xlu1 %113, %v13_v1   ;;  %63 = vperm.xlu0 %114, %v14_v3  }
  0x14   :  { %67 = vperm.xlu1 %113, %v15_v0   ;;  %116 = vset.pattern.permute.xlu0 %v144_v6 }
  0x18   :  { %115 = vset.pattern.permute.xlu1 %v144_v6 }
  0x19   :  { %84 = vperm.xlu1 %115, %v13_v1  }
  0x81   :  { %v29_v7 = vpop.permute.xlu1 %28  ;;  %v19_v8 = vpop.permute.xlu0 %18 }
  0x82   :  { %v37_v12 = vmul.f32 %v103_v10, %v19_v8  ;;  %v39_v18 = vmul.f32 %v103_v10, %v29_v7 }
  0x85   :  { %v24_v9 = vpop.permute.xlu0 %23 }
  0x86   :  { %v42_v11 = vpop.permute.xlu1 %41  ;;  %v38_v13 = vmul.f32 %v103_v10, %v24_v9 }
  0x87   :  { %v52_v16 = vadd.f32 %v42_v11, %v37_v12 }
  0x89   :  { %v55_v21 = vmax.f32 %v52_v16, 0.0 }
  0x8a   :  { %v50_v14 = vpop.permute.xlu1 %49  ;;  %v46_v15 = vpop.permute.xlu0 %45 }
  0x8b   :  { %v53_v17 = vadd.f32 %v46_v15, %v38_v13  ;;  %v54_v20 = vadd.f32 %v50_v14, %v39_v18 }
  0x8d   :  { %v56_v19 = vmax.f32 %v53_v17, 0.0  ;;  %v57_v26 = vmax.f32 %v54_v20, 0.0 }
  0x8f   :  { %v60_v22 = vpop.permute.xlu1 %59  ;;  %v64_v23 = vpop.permute.xlu0 %63 }
  0x90   :  { %v70_v24 = vmul.f32 %v60_v22, %v55_v21  ;;  %v71_v25 = vmul.f32 %v64_v23, %v56_v19 }
  0x92   :  { %v73_v29 = vadd.f32 %v71_v25, %v70_v24 }
  0x93   :  { %v68_v27 = vpop.permute.xlu1 %67 }
  0x94   :  { %v72_v28 = vmul.f32 %v68_v27, %v57_v26 }
  0x96   :  { %v75_v30 = vsel %vm74_vm0, %v72_v28, 0.0 }
  0x97   :  { %v76_v31 = vadd.f32 %v75_v30, %v73_v29 }
  0x98   :  { %v85_v37 = vpop.permute.xlu1 %84 }
  0x99   :  { %v77_v32 = vrot.slane %v76_v31, 4 }
  0x9b   :  { %v78_v33 = vadd.f32 %v77_v32, %v76_v31 }
  0x9d   :  { %v79_v34 = vrot.slane %v78_v33, 2 }
  0x9f   :  { %v80_v35 = vadd.f32 %v79_v34, %v78_v33 }
  0xa1   :  { %v81_v36 = vrot.slane %v80_v35, 1 }
  0xa3   :  { %v82_v38 = vadd.f32 %v81_v36, %v80_v35 }
  0xa5   :  { %v87_v39 = vadd.f32 %v85_v37, %v82_v38 }
  0xa7   :  { %88 = vst [vmem:[#allocation2] sm:$0x1] %v87_v39 }
  0xa8   :  { %128 = shalt.err (!%p125_p4)
}
  0xa9   :  { %s129_s21 = scalar_lea.hbm %s187_s2, 16 }
  0xaa   :  { %p130_p5 = scmp.ne.s32.totalorder %s187_s2, %s129_s21  ;;  %p133_p6 = scmp.lt.u32.totalorder %s129_s21, %s187_s2 }
  0xac   :  { %p135_p7 = pnand %p133_p6, %p130_p5 }
  0xae   :  { %138 = shalt.err (!%p135_p7)
}
  0xaf   :  { %98 = dma.vmem_to_hbm [thread:$0]  %s96_s16, 16, %s187_s2, [#allocation3]  }
  0xb0   :  { %139 = dma.done.wait [#allocation3], 16  }
  0xb1   :  { %140 = vsyncadd [#allocation3], 4294967280 }
  0xb2   :  { %102 = vsyncpa [#allocation3], 1 }

</bundles_post_ra>
